<compile_context>
chip_gen: v7x
topology: tpu7x:2x2x1
jax: 0.10.0
libtpu: 0.0.40
codegen_flags: <defaults>
</compile_context>

<pallas_src>
import jax
import jax.numpy as jnp
from jax.experimental import pallas as pl
from jax.experimental.pallas import tpu as pltpu

_MIB = 1024 * 1024
_PACKED_BLOCK_BYTES = 4 * _MIB        # per-buffer input block, packed path


# -----------------------------------------------------------------------------
# Chip-dependent budgets
# -----------------------------------------------------------------------------
def _chip_info():
    """Best-effort (num_tensorcores, vmem_capacity_bytes) for device 0."""
    num_cores, vmem_bytes = 1, 128 * _MIB
    try:
        kind = jax.devices()[0].device_kind.lower()
    except Exception:
        kind = ""
    if "v7" in kind:                   # v7x: 2 TensorCores, 64 MiB VMEM per TC
        num_cores, vmem_bytes = 2, 64 * _MIB
    try:
        info = pltpu.get_tpu_info()
        vmem_bytes = int(getattr(info, "vmem_capacity_bytes", vmem_bytes))
    except Exception:
        pass
    return num_cores, vmem_bytes


def _budgets():
    num_cores, vmem_bytes = _chip_info()
    packed_block = _PACKED_BLOCK_BYTES
    plane_block = 4 * _MIB if vmem_bytes <= 64 * _MIB else 8 * _MIB
    vmem_limit = min((vmem_bytes * 3) // 4, 96 * _MIB)
    return num_cores, packed_block, plane_block, vmem_limit


# -----------------------------------------------------------------------------
# Packed path: each (H, W) plane is flattened into the lane axis -> (tp, H*W)
# -----------------------------------------------------------------------------
def _make_packed_kernel(w, hw, nc, tp, has_tail):
    ngroups, rem = divmod(tp, 8)

    def kernel(mh_ref, mw_ref, x_ref, h_ref, w_ref):
        i = pl.program_id(1)

        @pl.when(i == 0)
        def _():
            h_ref[...] = jnp.zeros_like(h_ref)
            w_ref[...] = jnp.zeros_like(w_ref)

        x = x_ref[...].astype(jnp.float32)                      # (tp, hw)

        if has_tail:
            # Zero planes past nc (partial tail block / clamped duplicate grid
            # steps) BEFORE the rolls so unspecified DMA padding never reaches
            # the accumulators.  One tiny (tp, 1) iota + a single select.
            b = pl.program_id(0) * pl.num_programs(1) + i
            pid = b * tp + jax.lax.broadcasted_iota(jnp.int32, (tp, 1), 0)
            x = jnp.where(pid < nc, x, 0.0)

        # Neighbours via lane rotation (XLU slot; no shifted-slice copies).
        x_w = pltpu.roll(x, shift=hw - 1, axis=1)               # x[:, l+1 (mod hw)]
        x_h = pltpu.roll(x, shift=hw - w, axis=1)               # x[:, l+w (mod hw)]
        d2h = (x_h - x) * (x_h - x)
        d2w = (x_w - x) * (x_w - x)

        if rem == 0:
            # Sublane-aligned 8-row group sums: pure VPU adds.  The resident
            # lane masks only depend on the lane, so they are applied once per
            # (8, hw) partial sum instead of per (tp, hw) block.
            gh = jnp.sum(d2h.reshape(ngroups, 8, hw), axis=0)
            gw = jnp.sum(d2w.reshape(ngroups, 8, hw), axis=0)
            h_ref[...] += mh_ref[...] * gh
            w_ref[...] += mw_ref[...] * gw
        else:
            # Tiny-nc fallback (fewer than 8 planes in total).
            h_ref[0:1, :] += mh_ref[...] * jnp.sum(d2h, axis=0, keepdims=True)
            w_ref[0:1, :] += mw_ref[...] * jnp.sum(d2w, axis=0, keepdims=True)

    return kernel


def _tv_sums_packed(x_flat, h, w, *, block_bytes, num_splits, vmem_limit):
    nc, hw = x_flat.shape
    itemsize = jnp.dtype(x_flat.dtype).itemsize
    sub = 8 * max(1, 4 // itemsize)          # sublane packing: 8 f32 / 16 bf16

    if nc < sub:
        tp = nc                              # block covers the full first dim
    else:
        tp = max(sub, (block_bytes // (hw * itemsize)) // sub * sub)
        tp = min(tp, (nc // sub) * sub)

    nb = pl.cdiv(nc, tp)                     # number of plane blocks
    s_split = max(1, min(num_splits, nb))
    t = pl.cdiv(nb, s_split)                 # plane blocks per split
    has_tail = (tp * nb != nc) or (s_split * t != nb)

    # Resident lane masks: valid H pair (l < (h-1)*w), valid W pair (l%w != w-1).
    lane = jnp.arange(hw, dtype=jnp.int32)
    mask_h = (lane < (h - 1) * w).astype(jnp.float32).reshape(1, hw)
    mask_w = ((lane % w) != (w - 1)).astype(jnp.float32).reshape(1, hw)

    kernel = _make_packed_kernel(w, hw, nc, tp, has_tail)

    h_parts, w_parts = pl.pallas_call(
        kernel,
        out_shape=(
            jax.ShapeDtypeStruct((8 * s_split, hw), jnp.float32),
            jax.ShapeDtypeStruct((8 * s_split, hw), jnp.float32),
        ),
        grid_spec=pltpu.PrefetchScalarGridSpec(
            num_scalar_prefetch=0,
            grid=(s_split, t),
            in_specs=[
                pl.BlockSpec((1, hw), lambda s, i: (0, 0)),     # mask_h (resident)
                pl.BlockSpec((1, hw), lambda s, i: (0, 0)),     # mask_w (resident)
                pl.BlockSpec((tp, hw),
                             lambda s, i: (jnp.minimum(s * t + i, nb - 1), 0)),
            ],
            out_specs=[
                pl.BlockSpec((8, hw), lambda s, i: (s, 0)),
                pl.BlockSpec((8, hw), lambda s, i: (s, 0)),
            ],
        ),
        compiler_params=pltpu.CompilerParams(
            # TODO(synk): verify on v7x that the leading size-2 "parallel" axis
            # really shards across both TensorCores (else switch to CORE_PARALLEL).
            dimension_semantics=("parallel", "arbitrary"),
            vmem_limit_bytes=vmem_limit,
        ),
    )(mask_h, mask_w, x_flat)
    return jnp.sum(h_parts), jnp.sum(w_parts)


# -----------------------------------------------------------------------------
# Plane-blocked path: block (pb, th, W); H tiled with a carried boundary row
# -----------------------------------------------------------------------------
def _make_plane_kernel(nc, h, w, pb, th, need_plane_mask, need_row_mask, use_roll):
    def kernel(x_ref, h_out, w_out, carry_ref):
        i = pl.program_id(1)
        j = pl.program_id(2)

        @pl.when((i == 0) & (j == 0))
        def _():
            h_out[...] = jnp.zeros_like(h_out)
            w_out[...] = jnp.zeros_like(w_out)

        x = x_ref[...].astype(jnp.float32)                      # (pb, th, w)

        if need_plane_mask:
            b = pl.program_id(0) * pl.num_programs(1) + i
            pid = b * pb + jax.lax.broadcasted_iota(jnp.int32, (pb, 1, 1), 0)
            x = jnp.where(pid < nc, x, 0.0)

        if need_row_mask:
            row = j * th + jax.lax.broadcasted_iota(jnp.int32, (1, th, 1), 1)
            x = jnp.where(row < h, x, 0.0)

        # ---- W direction --------------------------------------------------
        if use_roll:
            x_r = pltpu.roll(x, shift=w - 1, axis=2)            # x[..., c+1 (mod w)]
            dw = x_r - x
            wsum = jnp.sum(dw * dw, axis=(0, 1)).reshape(1, w)
            col = jax.lax.broadcasted_iota(jnp.int32, (1, w), 1)
            w_out[...] += jnp.where(col < w - 1, wsum, 0.0)
        else:
            # TODO(synk): W not a multiple of 128 -- keep the (copy-making)
            # shifted lane slice here until the odd-width roll is verified.
            dw = x[:, :, 1:] - x[:, :, : w - 1]                 # (pb, th, w-1)
            w_out[:, : w - 1] += jnp.sum(dw * dw, axis=(0, 1)).reshape(1, w - 1)

        # ---- H direction ---------------------------------------------------
        # TODO(synk): swap the shifted sublane slices for a sublane pltpu.roll
        # once verified on all target chips (slices materialise a block copy).
        if th > 1:
            dh = x[:, 1:, :] - x[:, : th - 1, :]                # (pb, th-1, w)
            if need_row_mask:
                nrow = (j * th + 1 +
                        jax.lax.broadcasted_iota(jnp.int32, (1, th - 1, 1), 1))
                dh = jnp.where(nrow < h, dh, 0.0)
            h_out[...] += jnp.sum(dh * dh, axis=(0, 1)).reshape(1, w)

        # Cross-tile boundary: first row of this H tile vs the carried last row
        # of the previous H tile of the same plane block.
        @pl.when(j > 0)
        def _():
            d0 = x[:, 0:1, :] - carry_ref[...]
            h_out[...] += jnp.sum(d0 * d0, axis=(0, 1)).reshape(1, w)

        carry_ref[...] = x[:, th - 1:th, :]

    return kernel


def _tv_sums_planes(x_planes, h, w, *, block_bytes, num_splits, vmem_limit,
                    h_tile=None, plane_block=None):
    nc = x_planes.shape[0]
    itemsize = jnp.dtype(x_planes.dtype).itemsize
    row_bytes = w * itemsize

    if h_tile is not None:
        th = h_tile
    elif h * row_bytes <= block_bytes or h <= 8:
        th = h
    else:
        th = max(8, min((block_bytes // row_bytes) // 8 * 8, (h // 8) * 8))

    if plane_block is not None:
        pb = plane_block
    else:
        pb = max(1, min(nc, block_bytes // max(1, th * row_bytes)))

    nb = pl.cdiv(nc, pb)
    s_split = max(1, min(num_splits, nb))
    t = pl.cdiv(nb, s_split)
    n_h = pl.cdiv(h, th)

    need_plane_mask = (pb * nb != nc) or (s_split * t != nb)
    need_row_mask = (h % th) != 0
    use_roll = (w % 128) == 0

    kernel = _make_plane_kernel(nc, h, w, pb, th,
                                need_plane_mask, need_row_mask, use_roll)

    h_parts, w_parts = pl.pallas_call(
        kernel,
        out_shape=(
            jax.ShapeDtypeStruct((s_split, w), jnp.float32),
            jax.ShapeDtypeStruct((s_split, w), jnp.float32),
        ),
        grid_spec=pltpu.PrefetchScalarGridSpec(
            num_scalar_prefetch=0,
            grid=(s_split, t, n_h),
            in_specs=[
                pl.BlockSpec((pb, th, w),
                             lambda s, i, j: (jnp.minimum(s * t + i, nb - 1), j, 0)),
            ],
            out_specs=[
                pl.BlockSpec((1, w), lambda s, i, j: (s, 0)),
                pl.BlockSpec((1, w), lambda s, i, j: (s, 0)),
            ],
            scratch_shapes=[pltpu.VMEM((pb, 1, w), jnp.float32)],
        ),
        compiler_params=pltpu.CompilerParams(
            dimension_semantics=("parallel", "arbitrary", "arbitrary"),
            vmem_limit_bytes=vmem_limit,
        ),
    )(x_planes)
    return jnp.sum(h_parts), jnp.sum(w_parts)


# -----------------------------------------------------------------------------
# Public entry point (matches TVLoss.forward) + pure-JAX reference
# -----------------------------------------------------------------------------
def tv_loss(x, tv_loss_weight=0.5, *, num_splits=None, force_path=None,
            h_tile=None, plane_block=None):
    """Pallas TPU implementation of TVLoss.forward for NCHW input x.

    `num_splits` / `force_path` / `h_tile` / `plane_block` are testing knobs.
    """
    n, c, h, w = x.shape
    nc = n * c
    itemsize = jnp.dtype(x.dtype).itemsize
    plane_bytes = h * w * itemsize

    cores, packed_budget, plane_budget, vmem_limit = _budgets()
    splits = cores if num_splits is None else num_splits

    if h < 2 or w < 2:
        # Degenerate shapes: keep PyTorch's behaviour (incl. divide-by-zero).
        xf = x.astype(jnp.float32)
        h_tv = jnp.sum(jnp.square(xf[:, :, 1:, :] - xf[:, :, :-1, :]))
        w_tv = jnp.sum(jnp.square(xf[:, :, :, 1:] - xf[:, :, :, :-1]))
    else:
        sub = 8 * max(1, 4 // itemsize)      # dtype-aware packing (bf16 fix)
        min_planes = nc if nc < sub else sub
        use_packed = (min_planes * plane_bytes <= packed_budget
                      and (h * w) % 128 == 0)
        if force_path == "packed":
            use_packed = True
        elif force_path == "plane":
            use_packed = False

        if use_packed:
            h_tv, w_tv = _tv_sums_packed(
                x.reshape(nc, h * w), h, w,
                block_bytes=packed_budget, num_splits=splits,
                vmem_limit=vmem_limit)
        else:
            h_tv, w_tv = _tv_sums_planes(
                x.reshape(nc, h, w), h, w,
                block_bytes=plane_budget, num_splits=splits,
                vmem_limit=vmem_limit, h_tile=h_tile, plane_block=plane_block)

    count_h = c * (h - 1) * w                # tensor_size(x[:, :, 1:, :])
    count_w = c * h * (w - 1)                # tensor_size(x[:, :, :, 1:])
    return tv_loss_weight * 2.0 * (h_tv / count_h + w_tv / count_w) / n


def tv_loss_ref(x, tv_loss_weight=0.5):
    """Pure-JAX reference (mirrors the PyTorch forward)."""
    n, c, h, w = x.shape
    xf = x.astype(jnp.float32)
    h_tv = jnp.sum(jnp.square(xf[:, :, 1:, :] - xf[:, :, :-1, :]))
    w_tv = jnp.sum(jnp.square(xf[:, :, :, 1:] - xf[:, :, :, :-1]))
    count_h = c * (h - 1) * w
    count_w = c * h * (w - 1)
    return tv_loss_weight * 2.0 * (h_tv / count_h + w_tv / count_w) / n


if __name__ == "__main__":
    # 1) main case: packed path, no tail.
    x = jax.random.normal(jax.random.PRNGKey(0), (2, 4, 16, 16),
                          dtype=jnp.float32)
    out = jax.block_until_ready(tv_loss(x))
    ref = tv_loss_ref(x)
    assert jnp.allclose(out, ref, rtol=1e-4, atol=1e-5), (out, ref)

    # 2) packed path: partial tail block + clamped duplicate grid step + forced
    #    2-way core split + grouped (8-row) accumulation with ngroups > 1.
    x2 = jax.random.normal(jax.random.PRNGKey(1), (2, 68, 128, 128),
                           dtype=jnp.float32)
    out2 = jax.block_until_ready(tv_loss(x2, num_splits=2))
    ref2 = tv_loss_ref(x2)
    assert jnp.allclose(out2, ref2, rtol=1e-4, atol=1e-3), (out2, ref2)

    # 3) packed path, bf16 input (stays bf16 through the DMA, cast in kernel).
    x3 = jax.random.normal(jax.random.PRNGKey(2), (2, 4, 16, 16),
                           dtype=jnp.bfloat16)
    out3 = jax.block_until_ready(tv_loss(x3))
    ref3 = tv_loss_ref(x3)
    assert jnp.allclose(out3, ref3, rtol=1e-3, atol=1e-4), (out3, ref3)

    # 4) plane-blocked path: H tiling with carried boundary row, partial last
    #    H tile, partial plane block, forced 2-way split.
    x4 = jax.random.normal(jax.random.PRNGKey(3), (2, 3, 40, 128),
                           dtype=jnp.float32)
    out4 = jax.block_until_ready(
        tv_loss(x4, force_path="plane", h_tile=16, plane_block=4, num_splits=2))
    ref4 = tv_loss_ref(x4)
    assert jnp.allclose(out4, ref4, rtol=1e-4, atol=1e-4), (out4, ref4)

    print("KERNEL_OK")
</pallas_src>

<mosaic_0001>
module attributes {stable_mosaic.version = 11 : i64} {
  func.func @kernel(%arg0: i32, %arg1: i32, %arg2: memref<1x256xf32, #tpu.memory_space<vmem>>, %arg3: memref<1x256xf32, #tpu.memory_space<vmem>>, %arg4: memref<8x256xf32, #tpu.memory_space<vmem>>, %arg5: memref<8x256xf32, #tpu.memory_space<vmem>>, %arg6: memref<8x256xf32, #tpu.memory_space<vmem>>) attributes {dimension_semantics = [#tpu.dimension_semantics<parallel>, #tpu.dimension_semantics<arbitrary>], iteration_bounds = array<i64: 1, 1>, scalar_prefetch = 0 : i64, scratch_operands = 0 : i64, tpu.core_type = #tpu.core_type<tc>, window_params = [{pipeline_mode = #tpu.pipeline_mode<synchronous>, transform_indices = @transform_0, window_bounds = array<i64: 1, 256>}, {pipeline_mode = #tpu.pipeline_mode<synchronous>, transform_indices = @transform_1, window_bounds = array<i64: 1, 256>}, {transform_indices = @transform_2, window_bounds = array<i64: 8, 256>}, {transform_indices = @transform_3, window_bounds = array<i64: 8, 256>}, {transform_indices = @transform_4, window_bounds = array<i64: 8, 256>}]} {
    %c0_i32 = arith.constant 0 : i32
    %0 = arith.cmpi eq, %arg1, %c0_i32 : i32
    %1 = arith.extui %0 : i1 to i32
    %c0_i32_0 = arith.constant 0 : i32
    %2 = arith.cmpi ne, %1, %c0_i32_0 : i32
    scf.if %2 {
      %cst_15 = arith.constant 0.000000e+00 : f32
      %28 = vector.broadcast %cst_15 : f32 to vector<8x256xf32>
      %c0_16 = arith.constant 0 : index
      %c0_17 = arith.constant 0 : index
      %29 = vector.load %arg5[%c0_16, %c0_17] : memref<8x256xf32, #tpu.memory_space<vmem>>, vector<8x256xf32>
      tpu.vector_store %arg5[%c0_16, %c0_17], %28 {strides = array<i32>} : memref<8x256xf32, #tpu.memory_space<vmem>>, vector<8x256xf32>,
      %cst_18 = arith.constant 0.000000e+00 : f32
      %30 = vector.broadcast %cst_18 : f32 to vector<8x256xf32>
      %c0_19 = arith.constant 0 : index
      %c0_20 = arith.constant 0 : index
      %31 = vector.load %arg6[%c0_19, %c0_20] : memref<8x256xf32, #tpu.memory_space<vmem>>, vector<8x256xf32>
      tpu.vector_store %arg6[%c0_19, %c0_20], %30 {strides = array<i32>} : memref<8x256xf32, #tpu.memory_space<vmem>>, vector<8x256xf32>,
    } else {
    }
    %c0 = arith.constant 0 : index
    %c0_1 = arith.constant 0 : index
    %3 = vector.load %arg4[%c0, %c0_1] : memref<8x256xf32, #tpu.memory_space<vmem>>, vector<8x256xf32>
    %c255_i32 = arith.constant 255 : i32
    %4 = tpu.dynamic_rotate %3 by %c255_i32 dim 1 : vector<8x256xf32>, i32 -> vector<8x256xf32>
    %c240_i32 = arith.constant 240 : i32
    %5 = tpu.dynamic_rotate %3 by %c240_i32 dim 1 : vector<8x256xf32>, i32 -> vector<8x256xf32>
    %6 = arith.subf %5, %3 : vector<8x256xf32>
    %7 = arith.subf %5, %3 : vector<8x256xf32>
    %8 = arith.mulf %6, %7 : vector<8x256xf32>
    %9 = arith.subf %4, %3 : vector<8x256xf32>
    %10 = arith.subf %4, %3 : vector<8x256xf32>
    %11 = arith.mulf %9, %10 : vector<8x256xf32>
    %12 = vector.shape_cast %8 : vector<8x256xf32> to vector<1x8x256xf32>
    %cst = arith.constant dense<0.000000e+00> : vector<8x256xf32>
    %13 = vector.multi_reduction <add>, %12, %cst [0] : vector<1x8x256xf32> to vector<8x256xf32>
    %14 = vector.shape_cast %11 : vector<8x256xf32> to vector<1x8x256xf32>
    %cst_2 = arith.constant dense<0.000000e+00> : vector<8x256xf32>
    %15 = vector.multi_reduction <add>, %14, %cst_2 [0] : vector<1x8x256xf32> to vector<8x256xf32>
    %c0_3 = arith.constant 0 : index
    %c0_4 = arith.constant 0 : index
    %16 = vector.load %arg5[%c0_3, %c0_4] : memref<8x256xf32, #tpu.memory_space<vmem>>, vector<8x256xf32>
    %c0_5 = arith.constant 0 : index
    %c0_6 = arith.constant 0 : index
    %17 = vector.load %arg2[%c0_5, %c0_6] : memref<1x256xf32, #tpu.memory_space<vmem>>, vector<1x256xf32>
    %18 = vector.broadcast %17 : vector<1x256xf32> to vector<8x256xf32>
    %19 = arith.mulf %18, %13 : vector<8x256xf32>
    %20 = arith.addf %16, %19 : vector<8x256xf32>
    %c0_7 = arith.constant 0 : index
    %c0_8 = arith.constant 0 : index
    %21 = vector.load %arg5[%c0_7, %c0_8] : memref<8x256xf32, #tpu.memory_space<vmem>>, vector<8x256xf32>
    tpu.vector_store %arg5[%c0_7, %c0_8], %20 {strides = array<i32>} : memref<8x256xf32, #tpu.memory_space<vmem>>, vector<8x256xf32>,
    %c0_9 = arith.constant 0 : index
    %c0_10 = arith.constant 0 : index
    %22 = vector.load %arg6[%c0_9, %c0_10] : memref<8x256xf32, #tpu.memory_space<vmem>>, vector<8x256xf32>
    %c0_11 = arith.constant 0 : index
    %c0_12 = arith.constant 0 : index
    %23 = vector.load %arg3[%c0_11, %c0_12] : memref<1x256xf32, #tpu.memory_space<vmem>>, vector<1x256xf32>
    %24 = vector.broadcast %23 : vector<1x256xf32> to vector<8x256xf32>
    %25 = arith.mulf %24, %15 : vector<8x256xf32>
    %26 = arith.addf %22, %25 : vector<8x256xf32>
    %c0_13 = arith.constant 0 : index
    %c0_14 = arith.constant 0 : index
    %27 = vector.load %arg6[%c0_13, %c0_14] : memref<8x256xf32, #tpu.memory_space<vmem>>, vector<8x256xf32>
    tpu.vector_store %arg6[%c0_13, %c0_14], %26 {strides = array<i32>} : memref<8x256xf32, #tpu.memory_space<vmem>>, vector<8x256xf32>,
    return
  }
  func.func @transform_0(%arg0: i32, %arg1: i32) -> (i32, i32) {
    %c0_i32 = arith.constant 0 : i32
    %c0_i32_0 = arith.constant 0 : i32
    %c0_i32_1 = arith.constant 0 : i32
    return %c0_i32, %c0_i32_0 : i32, i32
  }
  func.func @transform_1(%arg0: i32, %arg1: i32) -> (i32, i32) {
    %c0_i32 = arith.constant 0 : i32
    %c0_i32_0 = arith.constant 0 : i32
    %c0_i32_1 = arith.constant 0 : i32
    return %c0_i32, %c0_i32_0 : i32, i32
  }
  func.func @transform_2(%arg0: i32, %arg1: i32) -> (i32, i32) {
    %c1_i32 = arith.constant 1 : i32
    %0 = arith.muli %arg0, %c1_i32 : i32
    %1 = arith.addi %0, %arg1 : i32
    %c0_i32 = arith.constant 0 : i32
    %2 = arith.minsi %1, %c0_i32 : i32
    %c0_i32_0 = arith.constant 0 : i32
    %c0_i32_1 = arith.constant 0 : i32
    return %2, %c0_i32_0 : i32, i32
  }
  func.func @transform_3(%arg0: i32, %arg1: i32) -> (i32, i32) {
    %c0_i32 = arith.constant 0 : i32
    %c0_i32_0 = arith.constant 0 : i32
    return %arg0, %c0_i32 : i32, i32
  }
  func.func @transform_4(%arg0: i32, %arg1: i32) -> (i32, i32) {
    %c0_i32 = arith.constant 0 : i32
    %c0_i32_0 = arith.constant 0 : i32
    return %arg0, %c0_i32 : i32, i32
  }
}

</mosaic_0001>

<bundles_post_ra>
// kernel: tpu_custom_call.1
= control target key start
LH: loop header
LB: loop body
LE: loop exit
PB: predicated region body
PF: predicated region fallthrough
CT: control target
= control target key end

     0   :  { %10 = vsyncpa [#allocation3], 0  ;;  %s397_s0 = inlined_call_operand.hbm [shape: f32[1,256], index: 0, kind: input, shape index: {}]   ;;  %s398_s1 = inlined_call_operand.hbm [shape: f32[1,256], index: 1, kind: input, shape index: {}]   ;;  %s399_s2 = inlined_call_operand.hbm [shape: f32[8,256], index: 2, kind: input, shape index: {}]   ;;  %s400_s3 = inlined_call_operand.hbm [shape: f32[8,256], index: 3, kind: output, shape index: {0}]   ;;  %s401_s4 = inlined_call_operand.hbm [shape: f32[8,256], index: 4, kind: output, shape index: {1}]  }
   0x1   :  { %11 = vsyncpa [#allocation6], 0 }
   0x2   :  { %12 = vsyncpa [#allocation4], 0 }
   0x3   :  { %13 = vsyncpa [#allocation10], 0  ;;  %s298_s15 = smov [#allocation5]   ;;  %s299_s17 = smov [#allocation2]  }
   0x4   :  { %s30_s16 = sshll.u32 %s298_s15, 4  ;;  %s20_s18 = sshll.u32 %s299_s17, 4  ;;  %s31_s16 = int_to_ptr.vmem [resolvable:$true] %s30_s16  ;;  %s21_s18 = int_to_ptr.vmem [resolvable:$true] %s20_s18 }
   0x5   :  { %s180_s21 = scalar_lea.hbm %s398_s1, 32 }
   0x6   :  { %p181_p0 = scmp.ne.s32.totalorder %s398_s1, %s180_s21  ;;  %p184_p1 = scmp.lt.u32.totalorder %s180_s21, %s398_s1 }
   0x8   :  { %p186_p2 = pnand %p184_p1, %p181_p0 }
   0xa   :  { %189 = shalt.err (!%p186_p2)
}
   0xb   :  { %s190_s26 = scalar_lea.vmem %s31_s16, 32  ;;  %p195_p4 = scmp.lt.s32.totalorder %s31_s16, %s31_s16 }
   0xc   :  { %p191_p3 = scmp.ne.s32.totalorder %s31_s16, %s190_s26  ;;  %p196_p5 = scmp.lt.s32.totalorder %s190_s26, %s190_s26 }
   0xe   :  { %p197_p6 = por %p196_p5, %p195_p4 }
  0x10   :  { %p198_p7 = pnand %p197_p6, %p191_p3 }
  0x12   :  { %201 = shalt.err (!%p198_p7)
}
  0x13   :  { %33 = dma.hbm_to_vmem [thread:$0]  %s398_s1, 32, %s31_s16, [#allocation6]  }
  0x14   :  { %s202_s5 = scalar_lea.hbm %s397_s0, 32 }
  0x15   :  { %p203_p8 = scmp.ne.s32.totalorder %s397_s0, %s202_s5  ;;  %p206_p9 = scmp.lt.u32.totalorder %s202_s5, %s397_s0 }
  0x17   :  { %p208_p10 = pnand %p206_p9, %p203_p8 }
  0x19   :  { %211 = shalt.err (!%p208_p10)
}
  0x1a   :  { %s212_s10 = scalar_lea.vmem %s21_s18, 32  ;;  %p217_p12 = scmp.lt.s32.totalorder %s21_s18, %s21_s18 }
  0x1b   :  { %p213_p11 = scmp.ne.s32.totalorder %s21_s18, %s212_s10  ;;  %p218_p13 = scmp.lt.s32.totalorder %s212_s10, %s212_s10 }
  0x1d   :  { %p219_p0 = por %p218_p13, %p217_p12 }
  0x1f   :  { %p220_p1 = pnand %p219_p0, %p213_p11 }
  0x21   :  { %223 = shalt.err (!%p220_p1)
}
  0x22   :  { %23 = dma.hbm_to_vmem [thread:$0]  %s397_s0, 32, %s21_s18, [#allocation3]  }
  0x23   :  { %s300_s12 = smov [#allocation7]   ;;  %s224_s16 = scalar_lea.hbm %s399_s2, 256 }
  0x24   :  { %s46_s13 = sshll.u32 %s300_s12, 4  ;;  %p225_p2 = scmp.ne.s32.totalorder %s399_s2, %s224_s16  ;;  %s47_s13 = int_to_ptr.vmem [resolvable:$true] %s46_s13 }
  0x25   :  { %p228_p3 = scmp.lt.u32.totalorder %s224_s16, %s399_s2 }
  0x27   :  { %p230_p4 = pnand %p228_p3, %p225_p2 }
  0x29   :  { %233 = shalt.err (!%p230_p4)
}
  0x2a   :  { %s234_s22 = scalar_lea.vmem %s47_s13, 256  ;;  %p239_p6 = scmp.lt.s32.totalorder %s47_s13, %s47_s13 }
  0x2b   :  { %p235_p5 = scmp.ne.s32.totalorder %s47_s13, %s234_s22  ;;  %p240_p7 = scmp.lt.s32.totalorder %s234_s22, %s234_s22 }
  0x2d   :  { %p241_p8 = por %p240_p7, %p239_p6 }
  0x2f   :  { %p242_p9 = pnand %p241_p8, %p235_p5 }
  0x31   :  { %245 = shalt.err (!%p242_p9)
}
  0x32   :  { %49 = dma.hbm_to_vmem [thread:$0]  %s399_s2, 256, %s47_s13, [#allocation6]  }
  0x33   :  { %290 = dma.done.wait [#allocation3], 32  }
  0x34   :  { %291 = vsyncadd [#allocation3], 4294967264 }
  0x35   :  { %292 = dma.done.wait [#allocation6], 288  }
  0x36   :  { %293 = vsyncadd [#allocation6], 4294967008  ;;  %v70_v0 = vld [vmem:[#allocation7] sm:$0xff]  ;;  %s301_s23 = smov 112   ;;  %s302_s24 = smov 127   ;;  %v71_v1 = vld [vmem:[#allocation7 + $0x8] sm:$0xff]  ;;  %v76_v2 = vlaneseq }
  0x37   :  { %81 = vrot.lane.b32.xlu1 %v70_v0, %s301_s23  ;;  %72 = vrot.lane.b32.xlu0 %v70_v0, %s302_s24  ;;  %v102_v9 = vld [vmem:[#allocation2] sm:$0x3]  ;;  %v122_v10 = vld [vmem:[#allocation5] sm:$0x3]  ;;  %s303_s2 = smov [#allocation8]   ;;  %s304_s26 = smov [#allocation9]  }
  0x38   :  { %v105_v3 = vshrl.u32 %v76_v2, 7  ;;  %v77_v4 = vand.u32 127, %v76_v2  ;;  %s146_s25 = sshll.u32 %s303_s2, 4  ;;  %s156_s27 = sshll.u32 %s304_s26, 4  ;;  %s147_s25 = int_to_ptr.vmem [resolvable:$true] %s146_s25  ;;  %s366_s27 = int_to_ptr.vmem [resolvable:$true] %s156_s27 }
  0x39   :  { %s246_s28 = scalar_lea.vmem %s147_s25, 256  ;;  %p251_p11 = scmp.lt.s32.totalorder %s147_s25, %s147_s25 }
  0x3a   :  { %v106_v7 = vsub.s32 0, %v105_v3  ;;  %v110_v8 = vsub.s32 1, %v105_v3  ;;  %vm85_vm0 = vcmp.lt.s32.totalorder %v77_v4, 112  ;;  %vm78_vm1 = vcmp.lt.s32.totalorder %v77_v4, 127  ;;  %p247_p10 = scmp.ne.s32.totalorder %s147_s25, %s246_s28  ;;  %p252_p12 = scmp.lt.s32.totalorder %s246_s28, %s246_s28 }
  0x3b   :  { %83 = vrot.lane.b32.xlu1 %v71_v1, %s301_s23  ;;  %74 = vrot.lane.b32.xlu0 %v71_v1, %s302_s24 }
  0x3c   :  { %v107_v11 = vrot.slane %v102_v9, %v106_v7  ;;  %v111_v12 = vrot.slane %v102_v9, %v110_v8  ;;  %v127_v14 = vrot.slane %v122_v10, %v106_v7  ;;  %v131_v15 = vrot.slane %v122_v10, %v110_v8  ;;  %p253_p13 = por %p252_p12, %p251_p11 }
  0x3e   :  { %p254_p0 = pnand %p253_p13, %p247_p10 }
  0xa9   :  { %v82_v5 = vpop.permute.xlu1 %81  ;;  %v73_v6 = vpop.permute.xlu0 %72 }
  0xad   :  { %v84_v13 = vpop.permute.xlu1 %83  ;;  %v75_v16 = vpop.permute.xlu0 %74 }
  0xae   :  { %v86_v17 = vsel %vm85_vm0, %v82_v5, %v84_v13  ;;  %v87_v18 = vsel %vm85_vm0, %v84_v13, %v82_v5  ;;  %v79_v19 = vsel %vm78_vm1, %v73_v6, %v75_v16  ;;  %v80_v20 = vsel %vm78_vm1, %v75_v16, %v73_v6 }
  0xaf   :  { %v88_v21 = vsub.f32 %v86_v17, %v70_v0  ;;  %v89_v22 = vsub.f32 %v87_v18, %v71_v1  ;;  %v92_v23 = vsub.f32 %v79_v19, %v70_v0  ;;  %v93_v24 = vsub.f32 %v80_v20, %v71_v1 }
  0xb1   :  { %v90_v25 = vmul.f32 %v88_v21, %v88_v21  ;;  %v91_v26 = vmul.f32 %v89_v22, %v89_v22  ;;  %v94_v27 = vmul.f32 %v92_v23, %v92_v23  ;;  %v95_v28 = vmul.f32 %v93_v24, %v93_v24 }
  0xb3   :  { %v114_v29 = vmul.f32 %v107_v11, %v90_v25  ;;  %v115_v30 = vmul.f32 %v111_v12, %v91_v26  ;;  %v134_v31 = vmul.f32 %v127_v14, %v94_v27  ;;  %v135_v32 = vmul.f32 %v131_v15, %v95_v28 }
  0xb5   :  { %118 = vst [vmem:[#allocation8] sm:$0xff] %v114_v29  ;;  %119 = vst [vmem:[#allocation8 + $0x8] sm:$0xff] %v115_v30 }
  0xb6   :  { %138 = vst [vmem:[#allocation9] sm:$0xff] %v134_v31  ;;  %139 = vst [vmem:[#allocation9 + $0x8] sm:$0xff] %v135_v32 }
  0xb7   :  { %257 = shalt.err (!%p254_p0)
}
  0xb8   :  { %s258_s5 = scalar_lea.hbm %s400_s3, 256 }
  0xb9   :  { %p259_p1 = scmp.ne.s32.totalorder %s400_s3, %s258_s5  ;;  %p262_p2 = scmp.lt.u32.totalorder %s258_s5, %s400_s3 }
  0xbb   :  { %p264_p3 = pnand %p262_p2, %p259_p1 }
  0xbd   :  { %267 = shalt.err (!%p264_p3)
}
  0xbe   :  { %149 = dma.vmem_to_hbm [thread:$0]  %s147_s25, 256, %s400_s3, [#allocation4]  }
  0xbf   :  { %s268_s11 = scalar_lea.vmem %s366_s27, 256  ;;  %p273_p5 = scmp.lt.s32.totalorder %s366_s27, %s366_s27 }
  0xc0   :  { %p269_p4 = scmp.ne.s32.totalorder %s366_s27, %s268_s11  ;;  %p274_p6 = scmp.lt.s32.totalorder %s268_s11, %s268_s11 }
  0xc2   :  { %p275_p7 = por %p274_p6, %p273_p5 }
  0xc4   :  { %p276_p8 = pnand %p275_p7, %p269_p4 }
  0xc6   :  { %279 = shalt.err (!%p276_p8)
}
  0xc7   :  { %s280_s14 = scalar_lea.hbm %s401_s4, 256 }
  0xc8   :  { %p281_p9 = scmp.ne.s32.totalorder %s401_s4, %s280_s14  ;;  %p284_p10 = scmp.lt.u32.totalorder %s280_s14, %s401_s4 }
  0xca   :  { %p286_p11 = pnand %p284_p10, %p281_p9 }
  0xcc   :  { %289 = shalt.err (!%p286_p11)
}
  0xcd   :  { %159 = dma.vmem_to_hbm [thread:$0]  %s366_s27, 256, %s401_s4, [#allocation10]  }
  0xce   :  { %294 = dma.done.wait [#allocation4], 256  }
  0xcf   :  { %295 = vsyncadd [#allocation4], 4294967040 }
  0xd0   :  { %296 = dma.done.wait [#allocation10], 256  }
  0xd1   :  { %297 = vsyncadd [#allocation10], 4294967040 }
  0xd2   :  { %166 = vsyncpa [#allocation3], 1 }
  0xd3   :  { %167 = vsyncpa [#allocation6], 1 }
  0xd4   :  { %168 = vsyncpa [#allocation4], 1 }
  0xd5   :  { %169 = vsyncpa [#allocation10], 1 }

</bundles_post_ra>
